<compile_context>
chip_gen: v7x
topology: tpu7x:2x2x1
jax: 0.10.0
libtpu: 0.0.40
codegen_flags: <defaults>
</compile_context>

<pallas_src>
import jax
import jax.numpy as jnp
from jax import lax
from jax.experimental import pallas as pl
from jax.experimental.pallas import tpu as pltpu


# ---------------------------------------------------------------------------
# Pallas kernel: full Selective_decoder forward (train path), single invocation.
# ---------------------------------------------------------------------------
def selective_decoder_kernel(
        d_ref,        # (B*T, F)   D = cat([H, V]), flattened over (batch, time)
        w_a1_ref,     # (F, F)     attention_1d weight^T
        b_a1_ref,     # (1, F)
        w_i2h_ref,    # (F, Hh)
        b_i2h_ref,    # (1, Hh)
        w_h2h_ref,    # (Hh, Hh)
        w_score_ref,  # (1, Hh)
        w_gh_ref,     # (F+Hh, 4Hh)  merged [weight_ih(g_t cols); weight_hh]^T
        b_lstm_ref,   # (1, 4Hh)     b_ih + b_hh
        ohc_ref,      # (S, B, 4Hh)  per-step one-hot row gather of weight_ih^T
        w_gen_ref,    # (Hh, Cp)     generator weight^T, lane-padded to 128
        b_gen_ref,    # (1, Cp)
        probs_ref):   # out: (S, B, Cp)
    S, B, _ = ohc_ref.shape
    N, F = d_ref.shape
    Hh = w_h2h_ref.shape[0]
    T = N // B

    # ---- loop-invariant prologue: one flat matmul each for gating and i2h ----
    dl = jnp.dot(d_ref[...], w_a1_ref[...],
                 preferred_element_type=jnp.float32) + b_a1_ref[...]      # (N, F)
    dp = jax.nn.sigmoid(dl) * dl                                          # D_prime
    i2h = jnp.dot(dp, w_i2h_ref[...],
                  preferred_element_type=jnp.float32) + b_i2h_ref[...]    # (N, Hh)
    # tile-aligned slices (T rows per batch) stacked back to per-batch 3D views
    dp3 = jnp.stack([dp[b * T:(b + 1) * T, :] for b in range(B)], axis=0)
    i2h3 = jnp.stack([i2h[b * T:(b + 1) * T, :] for b in range(B)], axis=0)

    w_score = w_score_ref[...]                     # (1, Hh)
    w_gh = w_gh_ref[...]
    b_lstm = b_lstm_ref[...]
    w_gen = w_gen_ref[...]
    b_gen = b_gen_ref[...]

    # ---- sequential decode: in-kernel fori_loop carrying (h, c) --------------
    def step(t, carry):
        h, c = carry                                                # (B, Hh) each
        h2h = jnp.dot(h, w_h2h_ref[...],
                      preferred_element_type=jnp.float32)           # (B, Hh)
        e = jnp.tanh(i2h3 + h2h[:, None, :])                        # (B, T, Hh)
        e_t = jnp.sum(e * w_score, axis=-1)                         # (B, T)

        m = jnp.max(e_t, axis=1, keepdims=True)                     # softmax / T
        ex = jnp.exp(e_t - m)
        a = ex * pl.reciprocal(jnp.sum(ex, axis=1, keepdims=True), approx=True)
        g = jnp.sum(a[:, :, None] * dp3, axis=1)                    # (B, F)

        gh = jnp.concatenate([g, h], axis=-1)                       # (B, 128 lanes)
        gates = (jnp.dot(gh, w_gh, preferred_element_type=jnp.float32)
                 + ohc_ref[t] + b_lstm)                             # (B, 4Hh) i,f,g,o
        i_g = jax.nn.sigmoid(gates[:, 0:Hh])
        f_g = jax.nn.sigmoid(gates[:, Hh:2 * Hh])
        g_g = jnp.tanh(gates[:, 2 * Hh:3 * Hh])
        o_g = jax.nn.sigmoid(gates[:, 3 * Hh:4 * Hh])
        c_new = f_g * c + i_g * g_g
        h_new = o_g * jnp.tanh(c_new)

        probs_ref[t] = (jnp.dot(h_new, w_gen,
                                preferred_element_type=jnp.float32) + b_gen)
        return (h_new, c_new)

    h0 = jnp.zeros((B, Hh), jnp.float32)
    c0 = jnp.zeros((B, Hh), jnp.float32)
    lax.fori_loop(0, S, step, (h0, c0))


def selective_decoder_forward(D, text, p):
    """Pallas decoder: D (B,T,F), text (B,S) int -> probs (B,S,C)."""
    B, T, F = D.shape
    Hh = p["w_h2h"].shape[0]
    C = p["w_gen"].shape[1]
    S = text.shape[1]
    Cp = ((C + 127) // 128) * 128            # lane-dense generator / probs width

    d_flat = D.reshape(B * T, F)
    # one-hot @ weight_ih(one-hot cols) is just a row gather of the weight;
    # hoist it out of the serial decode chain (done once in the wrapper).
    ohc = jnp.transpose(jnp.take(p["w_ih_c"], text, axis=0), (1, 0, 2))  # (S,B,4Hh)
    w_gh = jnp.concatenate([p["w_ih_g"], p["w_hh"]], axis=0)             # (F+Hh,4Hh)
    b_lstm = p["b_ih"] + p["b_hh"]
    w_gen = jnp.pad(p["w_gen"], ((0, 0), (0, Cp - C)))
    b_gen = jnp.pad(p["b_gen"], ((0, 0), (0, Cp - C)))

    flops = int(2 * B * T * F * (F + Hh)
                + S * 2 * B * (Hh * Hh + (F + Hh) * 4 * Hh + Hh * Cp))
    transc = int(B * T * F + S * (B * T * Hh + B * T + 5 * B * Hh))
    bytes_acc = int(4 * (d_flat.size + p["w_a1"].size + p["b_a1"].size
                         + p["w_i2h"].size + p["b_i2h"].size + p["w_h2h"].size
                         + p["w_score"].size + w_gh.size + b_lstm.size
                         + ohc.size + w_gen.size + b_gen.size + S * B * Cp))

    vmem = pl.BlockSpec(memory_space=pltpu.MemorySpace.VMEM)
    probs_pad = pl.pallas_call(
        selective_decoder_kernel,
        out_shape=jax.ShapeDtypeStruct((S, B, Cp), jnp.float32),
        in_specs=[vmem] * 12,
        out_specs=vmem,
        compiler_params=pltpu.CompilerParams(vmem_limit_bytes=8 * 1024 * 1024),
        cost_estimate=pl.CostEstimate(flops=flops, transcendentals=transc,
                                      bytes_accessed=bytes_acc),
    )(d_flat, p["w_a1"], p["b_a1"], p["w_i2h"], p["b_i2h"], p["w_h2h"],
      p["w_score"], w_gh, b_lstm, ohc, w_gen, b_gen)

    return jnp.transpose(probs_pad[:, :, :C], (1, 0, 2))   # (B, S, C)


# ---------------------------------------------------------------------------
# Plain-JAX encoder: 2-layer bidirectional LSTM + output linear (torch layout).
# ---------------------------------------------------------------------------
def _lstm_direction(x, w_ih, w_hh, b_ih, b_hh, reverse):
    B = x.shape[0]
    h_dim = w_hh.shape[1]

    def step(carry, xt):
        h, c = carry
        gates = xt @ w_ih.T + b_ih + h @ w_hh.T + b_hh
        i, f, g, o = jnp.split(gates, 4, axis=-1)
        c = jax.nn.sigmoid(f) * c + jax.nn.sigmoid(i) * jnp.tanh(g)
        h = jax.nn.sigmoid(o) * jnp.tanh(c)
        return (h, c), h

    xs = jnp.swapaxes(x, 0, 1)
    if reverse:
        xs = xs[::-1]
    carry0 = (jnp.zeros((B, h_dim), x.dtype), jnp.zeros((B, h_dim), x.dtype))
    _, ys = lax.scan(step, carry0, xs)
    if reverse:
        ys = ys[::-1]
    return jnp.swapaxes(ys, 0, 1)


def bilstm_2layer(V, p):
    out = V
    for l in range(2):
        fwd = _lstm_direction(out, p[f"lstm_w_ih_l{l}"], p[f"lstm_w_hh_l{l}"],
                              p[f"lstm_b_ih_l{l}"], p[f"lstm_b_hh_l{l}"], False)
        bwd = _lstm_direction(out, p[f"lstm_w_ih_l{l}r"], p[f"lstm_w_hh_l{l}r"],
                              p[f"lstm_b_ih_l{l}r"], p[f"lstm_b_hh_l{l}r"], True)
        out = jnp.concatenate([fwd, bwd], axis=-1)
    return out


def scr_block_forward(V, text, params):
    """Selective_Contextual_refinement_block.forward (is_train=True, decoder_fix=False)."""
    Hb = bilstm_2layer(V, params)                          # (B, T, 2*hidden)
    H = Hb @ params["w_lin"] + params["b_lin"]             # (B, T, output_size)
    D = jnp.concatenate([H, V], axis=-1)                   # (B, T, F)
    probs = selective_decoder_forward(D, text, params)     # (B, S, C)
    return H, probs


# ---------------------------------------------------------------------------
# Pure-JAX reference for the Selective_decoder (mirrors the PyTorch code).
# ---------------------------------------------------------------------------
def selective_decoder_ref(D, text, p):
    B, T, F = D.shape
    Hh = p["w_h2h"].shape[0]
    C = p["w_gen"].shape[1]
    S = text.shape[1]

    dl = D @ p["w_a1"] + p["b_a1"]
    D_prime = jax.nn.sigmoid(dl) * dl
    w_ih = jnp.concatenate([p["w_ih_g"], p["w_ih_c"]], axis=0)
    b_lstm = p["b_ih"] + p["b_hh"]

    h = jnp.zeros((B, Hh), jnp.float32)
    c = jnp.zeros((B, Hh), jnp.float32)
    probs = []
    for i in range(S):
        oh = jax.nn.one_hot(text[:, i], C, dtype=jnp.float32)
        i2h = D_prime @ p["w_i2h"] + p["b_i2h"]
        h2h = h @ p["w_h2h"]
        e_t = jnp.sum(jnp.tanh(i2h + h2h[:, None, :]) * p["w_score"],
                      axis=-1, keepdims=True)              # (B, T, 1)
        a = jax.nn.softmax(e_t, axis=1)
        g = jnp.sum(a * D_prime, axis=1)                   # (B, F)
        x = jnp.concatenate([g, oh], axis=-1)
        gates = x @ w_ih + h @ p["w_hh"] + b_lstm
        i_g = jax.nn.sigmoid(gates[:, :Hh])
        f_g = jax.nn.sigmoid(gates[:, Hh:2 * Hh])
        g_g = jnp.tanh(gates[:, 2 * Hh:3 * Hh])
        o_g = jax.nn.sigmoid(gates[:, 3 * Hh:])
        c = f_g * c + i_g * g_g
        h = o_g * jnp.tanh(c)
        probs.append(h @ p["w_gen"] + p["b_gen"])
    return jnp.stack(probs, axis=1)


# ---------------------------------------------------------------------------
# Parameter init (weights stored pre-transposed: (in_features, out_features)).
# ---------------------------------------------------------------------------
def init_params(key, input_size, hidden_size, output_size, num_classes):
    F = output_size + input_size    # decoder feature dim = cat([H, V])
    Hh = F                          # AttentionCell hidden size
    C = num_classes
    keys = iter(jax.random.split(key, 48))

    def u(shape, fan_in):
        bound = 1.0 / float(fan_in) ** 0.5
        return jax.random.uniform(next(keys), shape, jnp.float32, -bound, bound)

    p = {}
    # BiLSTM_1 (torch layout: w_ih (4h, in), w_hh (4h, h))
    for l in range(2):
        in_dim = input_size if l == 0 else 2 * hidden_size
        for suf in ("", "r"):
            p[f"lstm_w_ih_l{l}{suf}"] = u((4 * hidden_size, in_dim), hidden_size)
            p[f"lstm_w_hh_l{l}{suf}"] = u((4 * hidden_size, hidden_size), hidden_size)
            p[f"lstm_b_ih_l{l}{suf}"] = u((4 * hidden_size,), hidden_size)
            p[f"lstm_b_hh_l{l}{suf}"] = u((4 * hidden_size,), hidden_size)
    # linear after BiLSTM
    p["w_lin"] = u((2 * hidden_size, output_size), 2 * hidden_size)
    p["b_lin"] = u((output_size,), 2 * hidden_size)
    # Selective_decoder.attention_1d
    p["w_a1"] = u((F, F), F)
    p["b_a1"] = u((1, F), F)
    # AttentionCell
    p["w_i2h"] = u((F, Hh), F)
    p["b_i2h"] = u((1, Hh), F)
    p["w_h2h"] = u((Hh, Hh), Hh)
    p["w_score"] = u((1, Hh), Hh)
    p["w_ih_g"] = u((F, 4 * Hh), Hh)      # LSTMCell weight_ih^T, g_t columns
    p["w_ih_c"] = u((C, 4 * Hh), Hh)      # LSTMCell weight_ih^T, one-hot columns
    p["w_hh"] = u((Hh, 4 * Hh), Hh)
    p["b_ih"] = u((1, 4 * Hh), Hh)
    p["b_hh"] = u((1, 4 * Hh), Hh)
    # Attention.generator
    p["w_gen"] = u((Hh, C), Hh)
    p["b_gen"] = u((1, C), Hh)
    return p


if __name__ == "__main__":
    B, T = 2, 8
    input_size = 32          # V feature dim
    hidden_size = 32
    output_size = 32         # must equal input_size for Selective_decoder dims
    num_classes = 8
    batch_max_length = 7
    num_steps = batch_max_length + 1

    key = jax.random.PRNGKey(0)
    kp, kv, kt = jax.random.split(key, 3)
    params = init_params(kp, input_size, hidden_size, output_size, num_classes)

    V = jax.random.normal(kv, (B, T, input_size), jnp.float32)
    text = jax.random.randint(kt, (B, num_steps), 0, num_classes)

    fwd = jax.jit(lambda v, t: scr_block_forward(v, t, params))
    H, probs = fwd(V, text)
    jax.block_until_ready((H, probs))

    # Validate the Pallas decoder against the pure-JAX reference on the same D.
    D = jnp.concatenate([H, V], axis=-1)
    probs_ref = selective_decoder_ref(D, text, params)

    assert H.shape == (B, T, output_size)
    assert probs.shape == (B, num_steps, num_classes)
    err = float(jnp.max(jnp.abs(probs - probs_ref)))
    # tolerance: ~2^-12 relative error from the approx (EUP) softmax reciprocal,
    # compounded through 8 recurrent LSTM steps, plus MXU-vs-XLA f32 drift.
    assert err < 2e-2, f"max abs err {err}"

    print("KERNEL_OK")
</pallas_src>

<mosaic_0001>
module attributes {stable_mosaic.version = 11 : i64} {
  func.func @selective_decoder_kernel(%arg0: memref<16x64xf32, #tpu.memory_space<vmem>>, %arg1: memref<64x64xf32, #tpu.memory_space<vmem>>, %arg2: memref<1x64xf32, #tpu.memory_space<vmem>>, %arg3: memref<64x64xf32, #tpu.memory_space<vmem>>, %arg4: memref<1x64xf32, #tpu.memory_space<vmem>>, %arg5: memref<64x64xf32, #tpu.memory_space<vmem>>, %arg6: memref<1x64xf32, #tpu.memory_space<vmem>>, %arg7: memref<128x256xf32, #tpu.memory_space<vmem>>, %arg8: memref<1x256xf32, #tpu.memory_space<vmem>>, %arg9: memref<8x2x256xf32, #tpu.memory_space<vmem>>, %arg10: memref<64x128xf32, #tpu.memory_space<vmem>>, %arg11: memref<1x128xf32, #tpu.memory_space<vmem>>, %arg12: memref<8x2x128xf32, #tpu.memory_space<vmem>>) attributes {dimension_semantics = [], scalar_prefetch = 0 : i64, scratch_operands = 0 : i64, tpu.core_type = #tpu.core_type<tc>} {
    %c0 = arith.constant 0 : index
    %c0_0 = arith.constant 0 : index
    %0 = vector.load %arg0[%c0, %c0_0] : memref<16x64xf32, #tpu.memory_space<vmem>>, vector<16x64xf32>
    %c0_1 = arith.constant 0 : index
    %c0_2 = arith.constant 0 : index
    %1 = vector.load %arg1[%c0_1, %c0_2] : memref<64x64xf32, #tpu.memory_space<vmem>>, vector<64x64xf32>
    %cst = arith.constant dense<0.000000e+00> : vector<16x64xf32>
    %2 = tpu.matmul %0, %1, %cst {dimension_numbers = #tpu.dot_dimension_numbers<[1], [0], [0], [1], [0, 0, 1, 1], [], []>} : vector<16x64xf32>, vector<64x64xf32>, vector<16x64xf32> -> vector<16x64xf32>
    %c0_3 = arith.constant 0 : index
    %c0_4 = arith.constant 0 : index
    %3 = vector.load %arg2[%c0_3, %c0_4] : memref<1x64xf32, #tpu.memory_space<vmem>>, vector<1x64xf32>
    %4 = vector.broadcast %3 : vector<1x64xf32> to vector<16x64xf32>
    %5 = arith.addf %2, %4 : vector<16x64xf32>
    %6 = arith.negf %5 : vector<16x64xf32>
    %7 = math.exp %6 : vector<16x64xf32>
    %cst_5 = arith.constant 1.000000e+00 : f32
    %8 = vector.broadcast %cst_5 : f32 to vector<16x64xf32>
    %9 = arith.addf %8, %7 : vector<16x64xf32>
    %10 = arith.divf %8, %9 : vector<16x64xf32>
    %11 = arith.mulf %10, %5 : vector<16x64xf32>
    %c0_6 = arith.constant 0 : index
    %c0_7 = arith.constant 0 : index
    %12 = vector.load %arg3[%c0_6, %c0_7] : memref<64x64xf32, #tpu.memory_space<vmem>>, vector<64x64xf32>
    %cst_8 = arith.constant dense<0.000000e+00> : vector<16x64xf32>
    %13 = tpu.matmul %11, %12, %cst_8 {dimension_numbers = #tpu.dot_dimension_numbers<[1], [0], [0], [1], [0, 0, 1, 1], [], []>} : vector<16x64xf32>, vector<64x64xf32>, vector<16x64xf32> -> vector<16x64xf32>
    %c0_9 = arith.constant 0 : index
    %c0_10 = arith.constant 0 : index
    %14 = vector.load %arg4[%c0_9, %c0_10] : memref<1x64xf32, #tpu.memory_space<vmem>>, vector<1x64xf32>
    %15 = vector.broadcast %14 : vector<1x64xf32> to vector<16x64xf32>
    %16 = arith.addf %13, %15 : vector<16x64xf32>
    %17 = vector.extract_strided_slice %11 {offsets = [0, 0], sizes = [8, 64], strides = [1, 1]} : vector<16x64xf32> to vector<8x64xf32>
    %18 = vector.extract_strided_slice %11 {offsets = [8, 0], sizes = [8, 64], strides = [1, 1]} : vector<16x64xf32> to vector<8x64xf32>
    %19 = vector.shape_cast %17 : vector<8x64xf32> to vector<1x8x64xf32>
    %20 = vector.shape_cast %18 : vector<8x64xf32> to vector<1x8x64xf32>
    %21 = tpu.concatenate %19, %20 in 0 : vector<1x8x64xf32>, vector<1x8x64xf32> -> vector<2x8x64xf32>
    %22 = vector.extract_strided_slice %16 {offsets = [0, 0], sizes = [8, 64], strides = [1, 1]} : vector<16x64xf32> to vector<8x64xf32>
    %23 = vector.extract_strided_slice %16 {offsets = [8, 0], sizes = [8, 64], strides = [1, 1]} : vector<16x64xf32> to vector<8x64xf32>
    %24 = vector.shape_cast %22 : vector<8x64xf32> to vector<1x8x64xf32>
    %25 = vector.shape_cast %23 : vector<8x64xf32> to vector<1x8x64xf32>
    %26 = tpu.concatenate %24, %25 in 0 : vector<1x8x64xf32>, vector<1x8x64xf32> -> vector<2x8x64xf32>
    %c0_11 = arith.constant 0 : index
    %c0_12 = arith.constant 0 : index
    %27 = vector.load %arg6[%c0_11, %c0_12] : memref<1x64xf32, #tpu.memory_space<vmem>>, vector<1x64xf32>
    %c0_13 = arith.constant 0 : index
    %c0_14 = arith.constant 0 : index
    %28 = vector.load %arg7[%c0_13, %c0_14] : memref<128x256xf32, #tpu.memory_space<vmem>>, vector<128x256xf32>
    %c0_15 = arith.constant 0 : index
    %c0_16 = arith.constant 0 : index
    %29 = vector.load %arg8[%c0_15, %c0_16] : memref<1x256xf32, #tpu.memory_space<vmem>>, vector<1x256xf32>
    %c0_17 = arith.constant 0 : index
    %c0_18 = arith.constant 0 : index
    %30 = vector.load %arg10[%c0_17, %c0_18] : memref<64x128xf32, #tpu.memory_space<vmem>>, vector<64x128xf32>
    %c0_19 = arith.constant 0 : index
    %c0_20 = arith.constant 0 : index
    %31 = vector.load %arg11[%c0_19, %c0_20] : memref<1x128xf32, #tpu.memory_space<vmem>>, vector<1x128xf32>
    %cst_21 = arith.constant 0.000000e+00 : f32
    %32 = vector.broadcast %cst_21 : f32 to vector<2x64xf32>
    %cst_22 = arith.constant 0.000000e+00 : f32
    %33 = vector.broadcast %cst_22 : f32 to vector<2x64xf32>
    %c0_i32 = arith.constant 0 : i32
    %c8_i32 = arith.constant 8 : i32
    %34 = arith.addi %c0_i32, %c8_i32 : i32
    %c1_i32 = arith.constant 1 : i32
    %35:2 = scf.for %arg13 = %c0_i32 to %34 step %c1_i32 iter_args(%arg14 = %32, %arg15 = %33) -> (vector<2x64xf32>, vector<2x64xf32>)  : i32 {
      %c0_24 = arith.constant 0 : index
      %c0_25 = arith.constant 0 : index
      %36 = vector.load %arg5[%c0_24, %c0_25] : memref<64x64xf32, #tpu.memory_space<vmem>>, vector<64x64xf32>
      %cst_26 = arith.constant dense<0.000000e+00> : vector<2x64xf32>
      %37 = tpu.matmul %arg14, %36, %cst_26 {dimension_numbers = #tpu.dot_dimension_numbers<[1], [0], [0], [1], [0, 0, 1, 1], [], []>} : vector<2x64xf32>, vector<64x64xf32>, vector<2x64xf32> -> vector<2x64xf32>
      %38 = vector.shape_cast %37 : vector<2x64xf32> to vector<2x1x64xf32>
      %39 = vector.broadcast %38 : vector<2x1x64xf32> to vector<2x8x64xf32>
      %40 = arith.addf %26, %39 : vector<2x8x64xf32>
      %41 = math.tanh %40 : vector<2x8x64xf32>
      %42 = vector.shape_cast %27 : vector<1x64xf32> to vector<1x1x64xf32>
      %43 = vector.broadcast %42 : vector<1x1x64xf32> to vector<2x8x64xf32>
      %44 = arith.mulf %41, %43 : vector<2x8x64xf32>
      %cst_27 = arith.constant dense<0.000000e+00> : vector<2x8xf32>
      %45 = vector.multi_reduction <add>, %44, %cst_27 [2] : vector<2x8x64xf32> to vector<2x8xf32>
      %cst_28 = arith.constant dense<0xFF800000> : vector<2xf32>
      %46 = vector.multi_reduction <maximumf>, %45, %cst_28 [1] : vector<2x8xf32> to vector<2xf32>
      %47 = vector.shape_cast %46 : vector<2xf32> to vector<2x1xf32>
      %48 = vector.broadcast %47 : vector<2x1xf32> to vector<2x8xf32>
      %49 = arith.subf %45, %48 : vector<2x8xf32>
      %50 = math.exp %49 : vector<2x8xf32>
      %cst_29 = arith.constant dense<0.000000e+00> : vector<2xf32>
      %51 = vector.multi_reduction <add>, %50, %cst_29 [1] : vector<2x8xf32> to vector<2xf32>
      %52 = vector.shape_cast %51 : vector<2xf32> to vector<2x1xf32>
      %53 = tpu.reciprocal %52 {approx = true} : vector<2x1xf32> -> vector<2x1xf32>
      %54 = vector.broadcast %53 : vector<2x1xf32> to vector<2x8xf32>
      %55 = arith.mulf %50, %54 : vector<2x8xf32>
      %56 = vector.shape_cast %55 : vector<2x8xf32> to vector<2x8x1xf32>
      %57 = vector.broadcast %56 : vector<2x8x1xf32> to vector<2x8x64xf32>
      %58 = arith.mulf %57, %21 : vector<2x8x64xf32>
      %cst_30 = arith.constant dense<0.000000e+00> : vector<2x64xf32>
      %59 = vector.multi_reduction <add>, %58, %cst_30 [1] : vector<2x8x64xf32> to vector<2x64xf32>
      %60 = tpu.concatenate %59, %arg14 in 1 : vector<2x64xf32>, vector<2x64xf32> -> vector<2x128xf32>
      %cst_31 = arith.constant dense<0.000000e+00> : vector<2x256xf32>
      %61 = tpu.matmul %60, %28, %cst_31 {dimension_numbers = #tpu.dot_dimension_numbers<[1], [0], [0], [1], [0, 0, 1, 1], [], []>} : vector<2x128xf32>, vector<128x256xf32>, vector<2x256xf32> -> vector<2x256xf32>
      %62 = arith.index_cast %arg13 : i32 to index
      %c0_32 = arith.constant 0 : index
      %c0_33 = arith.constant 0 : index
      %63 = vector.load %arg9[%62, %c0_32, %c0_33] : memref<8x2x256xf32, #tpu.memory_space<vmem>>, vector<1x2x256xf32>
      %64 = vector.shape_cast %63 : vector<1x2x256xf32> to vector<2x256xf32>
      %65 = arith.addf %61, %64 : vector<2x256xf32>
      %66 = vector.broadcast %29 : vector<1x256xf32> to vector<2x256xf32>
      %67 = arith.addf %65, %66 : vector<2x256xf32>
      %68 = vector.extract_strided_slice %67 {offsets = [0, 0], sizes = [2, 64], strides = [1, 1]} : vector<2x256xf32> to vector<2x64xf32>
      %69 = arith.negf %68 : vector<2x64xf32>
      %70 = math.exp %69 : vector<2x64xf32>
      %cst_34 = arith.constant 1.000000e+00 : f32
      %71 = vector.broadcast %cst_34 : f32 to vector<2x64xf32>
      %72 = arith.addf %71, %70 : vector<2x64xf32>
      %73 = arith.divf %71, %72 : vector<2x64xf32>
      %74 = vector.extract_strided_slice %67 {offsets = [0, 64], sizes = [2, 64], strides = [1, 1]} : vector<2x256xf32> to vector<2x64xf32>
      %75 = arith.negf %74 : vector<2x64xf32>
      %76 = math.exp %75 : vector<2x64xf32>
      %cst_35 = arith.constant 1.000000e+00 : f32
      %77 = vector.broadcast %cst_35 : f32 to vector<2x64xf32>
      %78 = arith.addf %77, %76 : vector<2x64xf32>
      %79 = arith.divf %77, %78 : vector<2x64xf32>
      %80 = vector.extract_strided_slice %67 {offsets = [0, 128], sizes = [2, 64], strides = [1, 1]} : vector<2x256xf32> to vector<2x64xf32>
      %81 = math.tanh %80 : vector<2x64xf32>
      %82 = vector.extract_strided_slice %67 {offsets = [0, 192], sizes = [2, 64], strides = [1, 1]} : vector<2x256xf32> to vector<2x64xf32>
      %83 = arith.negf %82 : vector<2x64xf32>
      %84 = math.exp %83 : vector<2x64xf32>
      %cst_36 = arith.constant 1.000000e+00 : f32
      %85 = vector.broadcast %cst_36 : f32 to vector<2x64xf32>
      %86 = arith.addf %85, %84 : vector<2x64xf32>
      %87 = arith.divf %85, %86 : vector<2x64xf32>
      %88 = arith.mulf %79, %arg15 : vector<2x64xf32>
      %89 = arith.mulf %73, %81 : vector<2x64xf32>
      %90 = arith.addf %88, %89 : vector<2x64xf32>
      %91 = math.tanh %90 : vector<2x64xf32>
      %92 = arith.mulf %87, %91 : vector<2x64xf32>
      %cst_37 = arith.constant dense<0.000000e+00> : vector<2x128xf32>
      %93 = tpu.matmul %92, %30, %cst_37 {dimension_numbers = #tpu.dot_dimension_numbers<[1], [0], [0], [1], [0, 0, 1, 1], [], []>} : vector<2x64xf32>, vector<64x128xf32>, vector<2x128xf32> -> vector<2x128xf32>
      %94 = vector.broadcast %31 : vector<1x128xf32> to vector<2x128xf32>
      %95 = arith.addf %93, %94 : vector<2x128xf32>
      %96 = arith.index_cast %arg13 : i32 to index
      %c0_38 = arith.constant 0 : index
      %c0_39 = arith.constant 0 : index
      %97 = vector.load %arg12[%96, %c0_38, %c0_39] : memref<8x2x128xf32, #tpu.memory_space<vmem>>, vector<1x2x128xf32>
      %98 = vector.shape_cast %97 : vector<1x2x128xf32> to vector<2x128xf32>
      %99 = vector.shape_cast %95 : vector<2x128xf32> to vector<1x2x128xf32>
      tpu.vector_store %arg12[%96, %c0_38, %c0_39], %99 {strides = array<i32>} : memref<8x2x128xf32, #tpu.memory_space<vmem>>, vector<1x2x128xf32>,
      scf.yield %92, %90 : vector<2x64xf32>, vector<2x64xf32>
    }
    %c8_i32_23 = arith.constant 8 : i32
    return
  }
}

</mosaic_0001>

<bundles_post_ra>
// kernel: custom-call.2
= control target key start
LH: loop header
LB: loop body
LE: loop exit
PB: predicated region body
PF: predicated region fallthrough
CT: control target
= control target key end

     0   :  { %s6_s0 = inlined_call_operand.vmem [shape: bf16[2,32], index: 0, kind: output, shape index: {}]  }

// kernel: custom-call.3
= control target key start
LH: loop header
LB: loop body
LE: loop exit
PB: predicated region body
PF: predicated region fallthrough
CT: control target
= control target key end

     0   :  { %s6_s0 = inlined_call_operand.vmem [shape: f32[2,32], index: 0, kind: output, shape index: {}]  }

// kernel: _lambda_.1
= control target key start
LH: loop header
LB: loop body
LE: loop exit
PB: predicated region body
PF: predicated region fallthrough
CT: control target
= control target key end

     0   :  { %vm58_vm0 = vcmask 523264   ;;  %s1569_s1 = inlined_call_operand.vmem [shape: f32[64,64], index: 1, kind: input, shape index: {}]   ;;  %s1570_s5 = inlined_call_operand.vmem [shape: f32[64,64], index: 5, kind: input, shape index: {}]   ;;  %s1571_s9 = inlined_call_operand.vmem [shape: f32[8,2,256], index: 9, kind: input, shape index: {}]   ;;  %s1572_s12 = inlined_call_operand.vmem [shape: f32[8,2,128], index: 12, kind: output, shape index: {}]   ;;  %s1573_s0 = inlined_call_operand.vmem [shape: f32[16,64], index: 0, kind: input, shape index: {}]   ;;  %s1574_s3 = inlined_call_operand.vmem [shape: f32[64,64], index: 3, kind: input, shape index: {}]   ;;  %s1575_s2 = inlined_call_operand.vmem [shape: f32[1,64], index: 2, kind: input, shape index: {}]   ;;  %s1576_s6 = inlined_call_operand.vmem [shape: f32[1,64], index: 6, kind: input, shape index: {}]   ;;  %s1577_s7 = inlined_call_operand.vmem [shape: f32[128,256], index: 7, kind: input, shape index: {}]   ;;  %s1578_s8 = inlined_call_operand.vmem [shape: f32[1,256], index: 8, kind: input, shape index: {}]   ;;  %s1579_s10 = inlined_call_operand.vmem [shape: f32[64,128], index: 10, kind: input, shape index: {}]   ;;  %s1580_s11 = inlined_call_operand.vmem [shape: f32[1,128], index: 11, kind: input, shape index: {}]   ;;  %s1581_s4 = inlined_call_operand.vmem [shape: f32[1,64], index: 4, kind: input, shape index: {}]  }
   0x1   :  { %v43_v0 = vld [vmem:[%s1569_s1] sm:$0xff]  ;;  %v44_v1 = vld [vmem:[%s1569_s1 + $0x8] sm:$0xff]  ;;  %v45_v2 = vld [vmem:[%s1569_s1 + $0x10] sm:$0xff] }
   0x2   :  { %v892_v3 = vpack.c.bf16 %v44_v1, %v43_v0  ;;  %v46_v4 = vld [vmem:[%s1569_s1 + $0x18] sm:$0xff]  ;;  %v47_v6 = vld [vmem:[%s1569_s1 + $0x20] sm:$0xff]  ;;  %v48_v7 = vld [vmem:[%s1569_s1 + $0x28] sm:$0xff] }
   0x3   :  { %v896_v5 = vpack.c.bf16 %v46_v4, %v45_v2  ;;  %v41_v8 = vld [vmem:[%s1573_s0] sm:$0xff]  ;;  %v900_v9 = vpack.c.bf16 %v48_v7, %v47_v6  ;;  %v49_v10 = vld [vmem:[%s1569_s1 + $0x30] sm:$0xff]  ;;  %v50_v11 = vld [vmem:[%s1569_s1 + $0x38] sm:$0xff] }
   0x4   :  { %893 = vmatprep.subr.bf16.mxu0 %v892_v3  ;;  %832 = vmatprep.mubr.msk.f32.mxu0 %vm58_vm0, %v41_v8  ;;  %v904_v12 = vpack.c.bf16 %v50_v11, %v49_v10  ;;  %v42_v13 = vld [vmem:[%s1573_s0 + $0x8] sm:$0xff]  ;;  %v154_v14 = vld [vmem:[%s1574_s3] sm:$0xff]  ;;  %v156_v17 = vld [vmem:[%s1574_s3 + $0x10] sm:$0xff] }
   0x5   :  { %895 = vmatpush3.bf16.msra.mxu0 %v892_v3  ;;  %v155_v15 = vld [vmem:[%s1574_s3 + $0x8] sm:$0xff]  ;;  %v157_v18 = vld [vmem:[%s1574_s3 + $0x18] sm:$0xff]  ;;  %v158_v20 = vld [vmem:[%s1574_s3 + $0x20] sm:$0xff] }
   0x6   :  { %897 = vmatprep.subr.bf16.mxu0 %v896_v5  ;;  %v908_v16 = vpack.c.bf16 %v155_v15, %v154_v14  ;;  %v912_v19 = vpack.c.bf16 %v157_v18, %v156_v17  ;;  %v159_v21 = vld [vmem:[%s1574_s3 + $0x28] sm:$0xff]  ;;  %v160_v23 = vld [vmem:[%s1574_s3 + $0x30] sm:$0xff]  ;;  %v161_v24 = vld [vmem:[%s1574_s3 + $0x38] sm:$0xff] }
   0x7   :  { %v916_v22 = vpack.c.bf16 %v159_v21, %v158_v20  ;;  %v920_v25 = vpack.c.bf16 %v161_v24, %v160_v23  ;;  %v760_v26 = vld [vmem:[%s1575_s2] ss:$0 sm:$0xff]  ;;  %v1217_v43 = vld [vmem:[%s1577_s7 + $0x8] sm:$0xff]  ;;  %v1222_v44 = vld [vmem:[%s1577_s7 + $0x10] sm:$0xff] }
   0x8   :  { %909 = vmatprep.subr.bf16.mxu1 %v908_v16  ;;  %v1207_v41 = vld [vmem:[%s1576_s6] ss:$0 sm:$0xff]  ;;  %v1227_v45 = vld [vmem:[%s1577_s7 + $0x18] sm:$0xff]  ;;  %v1237_v47 = vld [vmem:[%s1577_s7 + $0x28] sm:$0xff] }
   0x9   :  { %899 = vmatpush3.bf16.msra.mxu0 %v896_v5  ;;  %911 = vmatpush3.bf16.msra.mxu1 %v908_v16  ;;  %1585 = vst [vmem:[#allocation2_spill] sm:$0xff] %v1207_v41  ;;  %v1212_v42 = vld [vmem:[%s1577_s7] sm:$0xff]  ;;  %v1242_v48 = vld [vmem:[%s1577_s7 + $0x30] sm:$0xff]  ;;  %v1247_v49 = vld [vmem:[%s1577_s7 + $0x38] sm:$0xff] }
   0xa   :  { %901 = vmatprep.subr.bf16.mxu0 %v900_v9  ;;  %913 = vmatprep.subr.bf16.mxu1 %v912_v19  ;;  %v1232_v46 = vld [vmem:[%s1577_s7 + $0x20] sm:$0xff]  ;;  %v1257_v51 = vld [vmem:[%s1577_s7 + $0x48] sm:$0xff]  ;;  %v1262_v52 = vld [vmem:[%s1577_s7 + $0x50] sm:$0xff] }
   0xb   :  { %v1252_v50 = vld [vmem:[%s1577_s7 + $0x40] sm:$0xff]  ;;  %v1267_v53 = vld [vmem:[%s1577_s7 + $0x58] sm:$0xff]  ;;  %v1277_v55 = vld [vmem:[%s1577_s7 + $0x68] sm:$0xff] }
   0xc   :  { %v1272_v54 = vld [vmem:[%s1577_s7 + $0x60] sm:$0xff]  ;;  %v1282_v56 = vld [vmem:[%s1577_s7 + $0x70] sm:$0xff]  ;;  %v1287_v57 = vld [vmem:[%s1577_s7 + $0x78] sm:$0xff] }
   0xd   :  { %903 = vmatpush3.bf16.msra.mxu0 %v900_v9  ;;  %915 = vmatpush3.bf16.msra.mxu1 %v912_v19  ;;  %v1292_v58 = vld [vmem:[%s1577_s7 + $0x80] sm:$0xff]  ;;  %v1297_v59 = vld [vmem:[%s1577_s7 + $0x88] sm:$0xff]  ;;  %v1302_v60 = vld [vmem:[%s1577_s7 + $0x90] sm:$0xff] }
   0xe   :  { %905 = vmatprep.subr.bf16.mxu0 %v904_v12  ;;  %917 = vmatprep.subr.bf16.mxu1 %v916_v22  ;;  %v1307_v61 = vld [vmem:[%s1577_s7 + $0x98] sm:$0xff]  ;;  %v1312_v62 = vld [vmem:[%s1577_s7 + $0xa0] sm:$0xff]  ;;  %v1317_v63 = vld [vmem:[%s1577_s7 + $0xa8] sm:$0xff] }
   0xf   :  { %v1322_v0 = vld [vmem:[%s1577_s7 + $0xb0] sm:$0xff]  ;;  %v1327_v1 = vld [vmem:[%s1577_s7 + $0xb8] sm:$0xff]  ;;  %v1332_v2 = vld [vmem:[%s1577_s7 + $0xc0] sm:$0xff] }
  0x10   :  { %v1337_v3 = vld [vmem:[%s1577_s7 + $0xc8] sm:$0xff]  ;;  %v1342_v4 = vld [vmem:[%s1577_s7 + $0xd0] sm:$0xff]  ;;  %v1347_v5 = vld [vmem:[%s1577_s7 + $0xd8] sm:$0xff] }
  0x11   :  { %907 = vmatpush3.bf16.msra.mxu0 %v904_v12  ;;  %919 = vmatpush3.bf16.msra.mxu1 %v916_v22  ;;  %v1352_v6 = vld [vmem:[%s1577_s7 + $0xe0] sm:$0xff]  ;;  %v1357_v7 = vld [vmem:[%s1577_s7 + $0xe8] sm:$0xff]  ;;  %v1362_v8 = vld [vmem:[%s1577_s7 + $0xf0] sm:$0xff] }
  0x12   :  { %921 = vmatprep.subr.bf16.mxu1 %v920_v25  ;;  %v1367_v9 = vld [vmem:[%s1577_s7 + $0xf8] sm:$0xff]  ;;  %v1372_v10 = vld [vmem:[%s1578_s8] sm:$0x3]  ;;  %v1382_v12 = vld [vmem:[%s1579_s10 + $0x8] sm:$0xff] }
  0x13   :  { %v1377_v11 = vld [vmem:[%s1579_s10] sm:$0xff]  ;;  %v1392_v14 = vld [vmem:[%s1579_s10 + $0x18] sm:$0xff]  ;;  %v1402_v16 = vld [vmem:[%s1579_s10 + $0x28] sm:$0xff] }
  0x14   :  { %833 = vmatmul.mubr.msk.f32.vlgmr.msra.gmra.mrb[0].mxu0 %vm58_vm0, %v42_v13  ;;  %v1387_v13 = vld [vmem:[%s1579_s10 + $0x10] sm:$0xff]  ;;  %v1397_v15 = vld [vmem:[%s1579_s10 + $0x20] sm:$0xff]  ;;  %v1412_v18 = vld [vmem:[%s1579_s10 + $0x38] sm:$0xff] }
  0x15   :  { %923 = vmatpush3.bf16.msra.mxu1 %v920_v25  ;;  %v1407_v17 = vld [vmem:[%s1579_s10 + $0x30] sm:$0xff]  ;;  %v1417_v19 = vld [vmem:[%s1580_s11] ss:$0 sm:$0xff]  ;;  %v1426_v25 = vmov 0.0   ;;  %s1430_s10 = smov 0  }
  0x16   :  { %1586 = vst [vmem:[#allocation3_spill] sm:$0xff] %v1417_v19  ;;  %v765_v20 = vld [vmem:[%s1581_s4] ss:$0 sm:$0xff] }
  0xe7   :  { %v834_v27 = vpop.f32.mrb[0].mxu0 }
  0xe8   :  { %v137_v28 = vadd.f32 %v834_v27, %v760_v26  ;;  %v131_v29 = vpop.f32.mrb[1].mxu0 }
  0xe9   :  { %v132_v30 = vadd.f32 %v760_v26, %v131_v29  ;;  %v1428_v26 = vmov 0.0  }
  0xea   :  { %v764_v31 = vmul.f32 -1.442695, %v137_v28 }
  0xeb   :  { %v763_v32 = vmul.f32 -1.442695, %v132_v30 }
  0xec   :  { %1010 = vpow2.f32 %v764_v31 }
  0xed   :  { %1012 = vpow2.f32 %v763_v32 }
  0xf6   :  { %v1011_v33 = vpop.eup %1010 }
  0xf7   :  { %v1013_v34 = vpop.eup %1012  ;;  %v147_v35 = vadd.f32 1.0, %v1011_v33 }
  0xf8   :  { %v146_v36 = vadd.f32 1.0, %v1013_v34 }
  0xf9   :  { %1014 = vrcp.f32 %v147_v35 }
  0xfa   :  { %1016 = vrcp.f32 %v146_v36 }
 0x103   :  { %v1015_v37 = vpop.eup %1014 }
 0x104   :  { %v1017_v38 = vpop.eup %1016  ;;  %v1198_v40 = vmul.f32 %v1015_v37, %v137_v28 }
 0x105   :  { %v1196_v39 = vmul.f32 %v1017_v38, %v132_v30 }
 0x107   :  { %851 = vmatprep.mubr.msk.f32.mxu1 %vm58_vm0, %v1196_v39 }
 0x108   :  { %852 = vmatmul.mubr.msk.f32.vlgmr.msra.gmra.mrb[0].mxu1 %vm58_vm0, %v1198_v40 }
 0x1db   :  { %v853_v21 = vpop.f32.mrb[0].mxu1 }
 0x1dc   :  { %v1422_v22 = vadd.f32 %v853_v21, %v765_v20  ;;  %v241_v23 = vpop.f32.mrb[1].mxu1 }
 0x1dd   :  { %v1424_v24 = vadd.f32 %v765_v20, %v241_v23 }
 0x1de   :  { %1587 = vst [vmem:[#allocation4_spill] sm:$0xff] %v1422_v22 }
 0x1df   :  { %1588 = vst [vmem:[#allocation5_spill] sm:$0xff] %v1424_v24 }
 0x1e0 LB: > { %v1589_v41 = vld [vmem:[#allocation2_spill] sm:$0xff]  ;;  %1590 = vst [vmem:[#allocation6_spill] sm:$0xff] %v1056_v25  ;;  %v302_v28 = vld [vmem:[%s1570_s5 + $0x8] sm:$0xff]  ;;  %v303_v29 = vld [vmem:[%s1570_s5 + $0x10] sm:$0xff]  ;;  %v1582_v30 = vmov 0.0|0.0   ;;  %s1067_s2 = smov 64   ;;  %v1056_v25 = vphi %v1426_v25, %v655_v25   ;;  %s1064_s10 = sphi %s1430_s10, %s298_s10   ;;  %v1060_v26 = vphi %v1428_v26, %v657_v26  }
 0x1e1   : > { %v301_v27 = vld [vmem:[%s1570_s5] sm:$0xff]  ;;  %924 = vmatprep.subr.bf16.mxu0 %v1582_v30  ;;  %v304_v32 = vld [vmem:[%s1570_s5 + $0x18] sm:$0xff]  ;;  %310 = vrot.lane.b32.xlu0 %v1060_v26, %s1067_s2  ;;  %vm1068_vm1 = vmmov 0   ;;  %v1069_v33 = vmov 0.0   ;;  %v306_v36 = vld [vmem:[%s1570_s5 + $0x28] sm:$0xff]  ;;  %vm447_vm2 = vcmask 1041409  }
 0x1e2   : > { %v925_v31 = vpack.c.bf16 %v302_v28, %v301_v27  ;;  %870 = vmatprep.mubr.msk.f32.mxu0 %vm1068_vm1, %v1069_v33  ;;  %v928_v34 = vpack.c.bf16 %v304_v32, %v303_v29  ;;  %616 = vmatprep.mubr.f32.mxu1 %v1069_v33  ;;  %v305_v35 = vld [vmem:[%s1570_s5 + $0x20] sm:$0xff]  ;;  %v307_v38 = vld [vmem:[%s1570_s5 + $0x30] sm:$0xff]  ;;  %v308_v20 = vld [vmem:[%s1570_s5 + $0x38] sm:$0xff]  ;;  %v1070_v27 = vmov 1966171168   ;;  %v388_v29 = vlaneseq  ;;  %s777_s26 = sshll.u32 %s1064_s10, 2 }
 0x1e3   : > { %v931_v37 = vpack.c.bf16 %v306_v36, %v305_v35  ;;  %v934_v21 = vpack.c.bf16 %v308_v20, %v307_v38  ;;  %v386_v28 = vunpack.c.l.s4 %v1070_v27  ;;  %vm450_vm3 = vcmask 58368   ;;  %s539_s6 = scalar_lea.vmem %s1571_s9, %s777_s26  ;;  %s770_s28 = sshll.u32 %s1064_s10, 1 }
 0x1e4   : > { %926 = vmatpush3.bf16.msra.mxu0 %v925_v31  ;;  %v389_v32 = vshrl.u32 %v388_v29, 7  ;;  %s739_s30 = scalar_lea.vmem %s1572_s12, %s770_s28  ;;  %s298_s10 = sadd.s32 1, %s1064_s10  }
 0x1e5   : > { %927 = vmatprep.subr.bf16.mxu0 %v1582_v30  ;;  %v387_v31 = vunpack.c.0.s8 %v386_v28  ;;  %v1592_v22 = vld [vmem:[#allocation4_spill] sm:$0xff]  ;;  %p295_p0 = scmp.ge.s32.totalorder %s298_s10, 8  }
 0x1e6   : > { %v1591_v24 = vld [vmem:[#allocation5_spill] sm:$0xff] }
 0x1e8   : > { %929 = vmatpush3.bf16.msra.mxu0 %v928_v34  ;;  %v390_v34 = vsub.s32 %v387_v31, %v389_v32 }
 0x1e9   : > { %930 = vmatprep.subr.bf16.mxu0 %v1582_v30 }
 0x1ec   : > { %932 = vmatpush3.bf16.msra.mxu0 %v931_v37  ;;  %v1475_v37 = vsub.s32 0, %v389_v32 }
 0x1ed   : > { %933 = vmatprep.subr.bf16.mxu0 %v1582_v30 }
 0x1f0   : > { %935 = vmatpush3.bf16.msra.mxu0 %v934_v21 }
 0x1f1   : > { %968 = vmatprep.subr.bf16.mxu0 %v1582_v30 }
 0x253   : > { %v311_v23 = vpop.permute.xlu0 %310 }
 0x254   : > { %871 = vmatmul.mubr.msk.f32.vlgmr.msra.gmra.mrb[0].mxu0 %vm58_vm0, %v311_v23 }
 0x255   : > { %889 = vmatprep.mubr.msk.f32.mxu0 %vm1068_vm1, %v1069_v33 }
 0x327   : > { %v380_v35 = vpop.f32.mrb[0].mxu0 }
 0x328   : > { %v391_v36 = vrot.slane %v380_v35, %v390_v34  ;;  %v872_v38 = vpop.f32.mrb[1].mxu0 }
 0x32a   : > { %v392_v20 = vcombine.high %v391_v36, %v391_v36  ;;  %v399_v21 = vrot.slane %v391_v36, %v390_v34  ;;  %v438_v36 = vand.u32 127, %v388_v29 }
 0x32c   : > { %v406_v19 = vrot.slane %v392_v20, %v390_v34  ;;  %v410_v30 = vrot.slane %v399_v21, %v1475_v37 }
 0x32e   : > { %v417_v23 = vadd.f32 %v410_v30, %v1591_v24  ;;  %v414_v33 = vrot.slane %v406_v19, %v1475_v37  ;;  %v441_v30 = vsub.s32 %v438_v36, %v389_v32 }
 0x330   : > { %1020 = vtanh.f32 %v417_v23  ;;  %v418_v27 = vadd.f32 %v414_v33, %v1592_v22 }
 0x332   : > { %1022 = vtanh.f32 %v418_v27 }
 0x33a   : > { %v1021_v28 = vpop.eup %1020 }
 0x33b   : > { %v427_v31 = vmul.f32 %v1021_v28, %v1589_v41  ;;  %v1071_v28 = vmov 0  }
 0x33c   : > { %v1023_v35 = vpop.eup %1022  ;;  %1018 = vset.pattern.permute.xlu1 %v1071_v28  ;;  %1019 = vset.pattern.permute.xlu0 %v1071_v28 }
 0x33d   : > { %v429_v25 = vsel %vm58_vm0, %v427_v31, 0.0  ;;  %v428_v38 = vmul.f32 %v1023_v35, %v1589_v41 }
 0x33e   : > { %430 = vadd.xlane.f32.xlu0 %v429_v25  ;;  %v1487_v25 = vsub.s32 1, %v389_v32 }
 0x33f   : > { %v432_v34 = vsel %vm58_vm0, %v428_v38, 0.0 }
 0x340   : > { %433 = vadd.xlane.f32.xlu1 %v432_v34 }
 0x3cb   : > { %v431_v20 = vpop.xlane.xlu0 %430 }
 0x3cc   : > { %v442_v21 = vrot.slane %v431_v20, %v441_v30 }
 0x3cd   : > { %v434_v19 = vpop.xlane.xlu1 %433 }
 0x3ce   : > { %v446_v23 = vrot.slane %v434_v19, %v441_v30 }
 0x3d0   : > { %v448_v33 = vsel %vm447_vm2, %v446_v23, %v442_v21 }
 0x3d1   : > { %v451_v27 = vsel %vm450_vm3, %v448_v33, -inf }
 0x3d2   : > { %452 = vmax.xlane.f32.xlu1 %v451_v27 }
 0x45f   : > { %v453_v31 = vpop.xlane.xlu1 %452 }
 0x460   : > { %v458_v29 = vrot.slane %v453_v31, %v1475_v37  ;;  %v462_v35 = vrot.slane %v453_v31, %v1487_v25  ;;  %v942_v31 = vpack.c.bf16 %v1242_v48, %v1232_v46 }
 0x462   : > { %v465_v38 = vsub.f32 %v431_v20, %v458_v29  ;;  %v466_v34 = vsub.f32 %v434_v19, %v462_v35  ;;  %v936_v20 = vpack.c.bf16 %v1227_v45, %v1217_v43  ;;  %v938_v19 = vpack.c.bf16 %v1222_v44, %v1212_v42 }
 0x463   : > { %v950_v29 = vpack.c.bf16 %v1282_v56, %v1272_v54 }
 0x464   : > { %v467_v36 = vmul.f32 1.442695, %v465_v38  ;;  %v469_v22 = vmul.f32 1.442695, %v466_v34  ;;  %937 = vmatprep.subr.bf16.mxu1 %v936_v20  ;;  %v956_v20 = vpack.c.bf16 %v1327_v1, %v1317_v63 }
 0x465   : > { %939 = vmatpush1.bf16.msra.mxu1 %v938_v19  ;;  %v958_v19 = vpack.c.bf16 %v1322_v0, %v1312_v62 }
 0x466   : > { %1024 = vpow2.f32 %v467_v36 }
 0x467   : > { %1026 = vpow2.f32 %v469_v22  ;;  %v940_v22 = vpack.c.bf16 %v1247_v49, %v1237_v47 }
 0x469   : > { %941 = vmatprep.subr.bf16.mxu1 %v940_v22  ;;  %v964_v22 = vpack.c.bf16 %v1367_v9, %v1357_v7 }
 0x46a   : > { %943 = vmatpush1.bf16.msra.mxu1 %v942_v31  ;;  %v966_v31 = vpack.c.bf16 %v1362_v8, %v1352_v6 }
 0x470   : > { %v1025_v21 = vpop.eup %1024 }
 0x471   : > { %474 = vperm.xlu1 %1018, %v1025_v21   ;;  %v1027_v23 = vpop.eup %1026 }
 0x475   : > { %477 = vperm.xlu1 %1018, %v1027_v23  }
 0x4f0   : > { %v475_v33 = vpop.permute.xlu1 %474 }
 0x4f1   : > { %v482_v28 = vrot.slane %v475_v33, %v441_v30 }
 0x4f4   : > { %v478_v27 = vpop.permute.xlu1 %477 }
 0x4f5   : > { %v486_v32 = vrot.slane %v478_v27, %v441_v30  ;;  %v944_v30 = vpack.c.bf16 %v1267_v53, %v1257_v51 }
 0x4f7   : > { %v487_v24 = vsel %vm447_vm2, %v486_v32, %v482_v28  ;;  %945 = vmatprep.subr.bf16.mxu1 %v944_v30  ;;  %v952_v28 = vpack.c.bf16 %v1307_v61, %v1297_v59  ;;  %v954_v32 = vpack.c.bf16 %v1302_v60, %v1292_v58 }
 0x4f8   : > { %v489_v41 = vsel %vm450_vm3, %v487_v24, 0.0  ;;  %v948_v24 = vpack.c.bf16 %v1287_v57, %v1277_v55 }
 0x4f9   : > { %490 = vadd.xlane.f32.xlu1 %v489_v41  ;;  %v946_v41 = vpack.c.bf16 %v1262_v52, %v1252_v50 }
 0x4fb   : > { %947 = vmatpush1.bf16.msra.mxu1 %v946_v41 }
 0x4fc   : > { %949 = vmatprep.subr.bf16.mxu1 %v948_v24 }
 0x4ff   : > { %951 = vmatpush1.bf16.msra.mxu1 %v950_v29 }
 0x500   : > { %953 = vmatprep.subr.bf16.mxu1 %v952_v28 }
 0x503   : > { %955 = vmatpush1.bf16.msra.mxu1 %v954_v32 }
 0x504   : > { %957 = vmatprep.subr.bf16.mxu1 %v956_v20 }
 0x507   : > { %959 = vmatpush1.bf16.msra.mxu1 %v958_v19 }
 0x586   : > { %v491_v35 = vpop.xlane.xlu1 %490 }
 0x587   : > { %1028 = vrcp.f32 %v491_v35 }
 0x591   : > { %v1029_v38 = vpop.eup %1028 }
 0x592   : > { %v501_v34 = vrot.slane %v1029_v38, %v1487_v25  ;;  %v497_v36 = vrot.slane %v1029_v38, %v1475_v37 }
 0x594   : > { %v505_v33 = vmul.f32 %v1027_v23, %v501_v34  ;;  %v504_v27 = vmul.f32 %v1025_v21, %v497_v36  ;;  %v960_v21 = vpack.c.bf16 %v1347_v5, %v1337_v3  ;;  %v962_v23 = vpack.c.bf16 %v1342_v4, %v1332_v2 }
 0x596   : > { %513 = vperm.xlu1 %1018, %v505_v33   ;;  %508 = vperm.xlu0 %1019, %v504_v27  }
 0x597   : > { %961 = vmatprep.subr.bf16.mxu1 %v960_v21 }
 0x598   : > { %963 = vmatpush1.bf16.msra.mxu1 %v962_v23 }
 0x599   : > { %965 = vmatprep.subr.bf16.mxu1 %v964_v22 }
 0x59c   : > { %967 = vmatpush1.bf16.msra.mxu1 %v966_v31 }
 0x615   : > { %v514_v30 = vpop.permute.xlu1 %513  ;;  %v509_v41 = vpop.permute.xlu0 %508 }
 0x616   : > { %v517_v24 = vmul.f32 %v514_v30, %v1198_v40  ;;  %v516_v29 = vmul.f32 %v509_v41, %v1196_v39 }
 0x618   : > { %v525_v35 = vsel %vm58_vm0, %v517_v24, 0.0  ;;  %v518_v38 = vsel %vm58_vm0, %v516_v29, 0.0  ;;  %v772_v24 = vld.sshfl [vmem:[%s539_s6] sm:$0x33 pattern:$0x76325410]  ;;  %v627_v29 = vrot.slane %v1372_v10, %v1475_v37  ;;  %v969_v37 = vpack.c.bf16 %v1382_v12, %v1377_v11 }
 0x619   : > { %v526_v34 = vrot.slane %v525_v35, 4  ;;  %v519_v36 = vrot.slane %v518_v38, 4 }
 0x61a   : > { %970 = vmatpush3.bf16.msra.mxu0 %v969_v37 }
 0x61b   : > { %v527_v33 = vadd.f32 %v526_v34, %v525_v35  ;;  %v520_v27 = vadd.f32 %v519_v36, %v518_v38 }
 0x61d   : > { %v528_v28 = vrot.slane %v527_v33, 2  ;;  %v521_v32 = vrot.slane %v520_v27, 2 }
 0x61f   : > { %v529_v20 = vadd.f32 %v528_v28, %v527_v33  ;;  %v522_v19 = vadd.f32 %v521_v32, %v520_v27  ;;  %v549_v27 = vcombine.high %v772_v24, %v772_v24 }
 0x621   : > { %v530_v21 = vrot.slane %v529_v20, 1  ;;  %v523_v23 = vrot.slane %v522_v19, 1 }
 0x623   : > { %v531_v22 = vadd.f32 %v530_v21, %v529_v20  ;;  %v524_v31 = vadd.f32 %v523_v23, %v522_v19 }
 0x625   : > { %v534_v30 = vsel %vm447_vm2, %v531_v22, %v524_v31  ;;  %v972_v31 = vpack.c.bf16 %v1392_v14, %v1387_v13 }
 0x626   : > { %v536_v41 = vsel %vm58_vm0, %v534_v30, %v1060_v26  ;;  %v631_v26 = vrot.slane %v1372_v10, %v1487_v25  ;;  %v1593_v30 = vmov 0.0|0.0   ;;  %v975_v25 = vpack.c.bf16 %v1402_v16, %v1397_v15 }
 0x627   : > { %617 = vmatmul.mubr.f32.vlgmr.msra.gmra.mrb[0].mxu1 %v536_v41  ;;  %971 = vmatprep.subr.bf16.mxu0 %v1593_v30  ;;  %v978_v41 = vpack.c.bf16 %v1412_v18, %v1407_v17 }
 0x628   : > { %973 = vmatpush3.bf16.msra.mxu0 %v972_v31 }
 0x629   : > { %974 = vmatprep.subr.bf16.mxu0 %v1593_v30 }
 0x62c   : > { %976 = vmatpush3.bf16.msra.mxu0 %v975_v25 }
 0x62d   : > { %977 = vmatprep.subr.bf16.mxu0 %v1593_v30 }
 0x630   : > { %979 = vmatpush3.bf16.msra.mxu0 %v978_v41 }
 0x6fa   : > { %v618_v35 = vpop.f32.mrb[0].mxu1 }
 0x6fb   : > { %v619_v38 = vadd.f32 %v772_v24, %v618_v35  ;;  %v620_v34 = vpop.f32.mrb[1].mxu1 }
 0x6fc   : > { %v621_v28 = vadd.f32 %v620_v34, %v549_v27 }
 0x6fd   : > { %v634_v36 = vadd.f32 %v627_v29, %v619_v38  ;;  %v1594_v38 = vld [vmem:[#allocation6_spill] sm:$0xff] }
 0x6fe   : > { %v635_v32 = vadd.f32 %v631_v26, %v621_v28 }
 0x6ff   : > { %v773_v33 = vmul.f32 -1.442695, %v634_v36 }
 0x700   : > { %v774_v24 = vmul.f32 -1.442695, %v635_v32 }
 0x701   : > { %1030 = vpow2.f32 %v773_v33 }
 0x702   : > { %1032 = vtanh.f32 %v635_v32  ;;  %v1595_v32 = vld [vmem:[#allocation3_spill] sm:$0xff] }
 0x70b   : > { %v1031_v20 = vpop.eup %1030 }
 0x70c   : > { %v639_v19 = vadd.f32 1.0, %v1031_v20  ;;  %v1033_v21 = vpop.eup %1032 }
 0x70e   : > { %1034 = vrcp.f32 %v639_v19 }
 0x70f   : > { %1036 = vpow2.f32 %v774_v24 }
 0x718   : > { %v1035_v23 = vpop.eup %1034 }
 0x719   : > { %v650_v22 = vmul.f32 %v1035_v23, %v1033_v21  ;;  %v1037_v29 = vpop.eup %1036  ;;  %v649_v34 = vmul.f32 %v1594_v38, %v1035_v23 }
 0x71a   : > { %v646_v35 = vadd.f32 1.0, %v1037_v29 }
 0x71b   : > { %652 = vrot.lane.b32.xlu0 %v650_v22, %s1067_s2 }
 0x71c   : > { %1038 = vrcp.f32 %v646_v35 }
 0x726   : > { %v1039_v33 = vpop.eup %1038 }
 0x78d   : > { %v653_v36 = vpop.permute.xlu0 %652 }
 0x78e   : > { %v655_v25 = vadd.f32 %v653_v36, %v649_v34  }
 0x790   : > { %1040 = vtanh.f32 %v655_v25 }
 0x79a   : > { %v1041_v27 = vpop.eup %1040 }
 0x79b   : > { %v657_v26 = vmul.f32 %v1041_v27, %v1039_v33  }
 0x79d   : > { %665 = vrot.lane.b32.xlu1 %v657_v26, %s1067_s2 }
 0x80f   : > { %v666_v28 = vpop.permute.xlu1 %665 }
 0x810   : > { %890 = vmatmul.mubr.msk.f32.vlgmr.msra.gmra.mrb[2].mxu0 %vm58_vm0, %v666_v28 }
 0x8e0   :  { %297 = sbr.rel (!%p295_p0) target bundleno = 480 (0x1e0), region = 77 }
 0x8e3   : > { %v735_v20 = vpop.f32.mrb[2].mxu0 }
 0x8e4   : > { %v736_v19 = vadd.f32 %v1595_v32, %v735_v20  ;;  %v891_v21 = vpop.f32.mrb[3].mxu0 }
 0x8e6   : > { %740 = vst [vmem:[%s739_s30] sm:$0x3] %v736_v19 }

</bundles_post_ra>
